<compile_context>
chip_gen: v5e
topology: v5e:2x2
jax: 0.10.0
libtpu: 0.0.40
codegen_flags: <defaults>
</compile_context>

<pallas_src>
import functools

import jax
import jax.numpy as jnp
from jax.experimental import pallas as pl
from jax.experimental.pallas import tpu as pltpu


def _round_up(n, m):
    return (n + m - 1) // m * m


def _make_kernel(tb, sp, ep, seq_len, compute_dtype, need_mask):
    """One grid step: `tb` batches of `sp` (padded) rows each."""
    R = tb * sp

    def kernel(x_ref, w_ref, b_ref, o_ref):
        # (tb, Sp, Ep) -> (R, Ep) is a tile-aligned (free) collapse; the cast
        # feeds the MXU (no-op in the f32 exact path).
        x2 = x_ref[...].reshape(R, ep).astype(compute_dtype)

        # One fused projection matmul: r = [K | V | qsum], f32 accumulation,
        # f32 bias row added afterwards.
        r = jnp.dot(x2, w_ref[...], preferred_element_type=jnp.float32)
        r = r + b_ref[...]

        k = r[:, :ep]                                # (R, Ep)
        qs = r[:, 2 * ep:2 * ep + 1]                 # (R, 1) collapsed-Q col

        # scores_2[b, e] = sum_s k[b, s, e] * qsum[b, s]  (1/sqrt(E) folded in)
        kq = (k * qs).reshape(tb, sp, ep)
        if need_mask:                                # zero seq-padding rows
            sid = jax.lax.broadcasted_iota(jnp.int32, (tb, sp, ep), 1)
            kq = jnp.where(sid < seq_len, kq, 0.0)
        s2 = jnp.sum(kq, axis=1, keepdims=True)      # (tb, 1, Ep)

        # V consumed last so k / kq can die first; single full-slab store.
        v = r[:, ep:2 * ep].reshape(tb, sp, ep)
        o_ref[...] = (v * s2).astype(o_ref.dtype)

    return kernel


def _resident_spec(shape, single_buffer):
    """Constant-index-map operand: fetched once, resident across the grid.

    For large operands request single-buffering (halves VMEM, matters on
    v7x's 64 MiB); fall back gracefully if pipeline_mode is unsupported.
    """
    index_map = lambda i: (0,) * len(shape)
    if single_buffer:
        try:
            return pl.BlockSpec(shape, index_map,
                                pipeline_mode=pl.Buffered(1))
        except (TypeError, AttributeError):
            pass
    return pl.BlockSpec(shape, index_map)


def self_attention(x, wq, bq, wk, bk, wv, bv, *,
                   compute_dtype=jnp.bfloat16, rows_per_block=512):
    """Pallas TPU forward of the SelfAttention module.

    x: (B, S, E); w*: (E, E) nn.Linear weights (out_features, in_features);
    b*: (E,).  compute_dtype feeds the MXU (bf16 default); accumulation, bias
    adds, the score reduction and the epilogue stay in f32.
    """
    B, S, E = x.shape
    out_dtype = x.dtype
    f32 = jnp.float32

    Ep = _round_up(E, 128)            # lane-dense blocks -> unmasked vld/vst
    Sp = _round_up(S, 8)              # sublane-aligned rows per batch
    Wn = 2 * Ep + 128                 # fused [K | V | qsum] output width
    scale = float(E) ** -0.5          # torch: scores_1 / sqrt(E)

    # ---- one-time parameter prep (plain XLA ops, outside the kernel) ----
    # Collapsed Q path with the score scale folded in:
    #   sum_e q[s, e] = x[s, :] @ Wq.sum(0) + bq.sum()
    wqc = (jnp.sum(wq, axis=0) * scale).astype(compute_dtype)        # (E,)
    w = jnp.zeros((Ep, Wn), compute_dtype)
    w = w.at[:E, :E].set(wk.T.astype(compute_dtype))                 # x @ Wk^T
    w = w.at[:E, Ep:Ep + E].set(wv.T.astype(compute_dtype))          # x @ Wv^T
    w = w.at[:E, 2 * Ep].set(wqc)                                    # qsum col
    bias = jnp.zeros((1, Wn), f32)
    bias = bias.at[0, :E].set(bk.astype(f32))
    bias = bias.at[0, Ep:Ep + E].set(bv.astype(f32))
    bias = bias.at[0, 2 * Ep].set((jnp.sum(bq) * scale).astype(f32))

    padded = (Sp != S) or (Ep != E)
    xp = x
    if padded:
        xp = jnp.pad(x, ((0, 0), (0, Sp - S), (0, Ep - E)))
    # Note: when S%8==0 and E%128==0 x is passed straight through (no pad /
    # reshape / cast copy in the wrapper); the cast happens in-kernel.

    x_bytes = jnp.dtype(xp.dtype).itemsize
    out_bytes = jnp.dtype(out_dtype).itemsize
    cd_bytes = jnp.dtype(compute_dtype).itemsize

    def _est_bytes(tb):
        R = tb * Sp
        return (2 * R * Ep * x_bytes                 # x block, double-buffered
                + 2 * R * Ep * out_bytes             # out block, double-buffered
                + 2 * (Ep * Wn * cd_bytes + Wn * 4)  # resident weight + bias
                + R * Ep * cd_bytes                  # casted x copy
                + R * Wn * 4                         # fused matmul result (f32)
                + R * Ep * 4                         # kq
                + R * Ep * out_bytes)                # staged output value

    # Batches per grid step: as many rows as fit the tiling sweet spot and a
    # v7x-friendly VMEM budget; prefer an even number of grid steps so the
    # "parallel" axis balances across v7x's two TensorCores.
    vmem_budget = 48 << 20
    divs = [d for d in range(1, B + 1) if B % d == 0]
    fit = [d for d in divs if d * Sp <= rows_per_block
           and _est_bytes(d) <= vmem_budget]
    if not fit:
        fit = [min(divs, key=_est_bytes)]
    even = [d for d in fit if (B // d) % 2 == 0]
    tb = max(even) if even else max(fit)
    R = tb * Sp
    grid = (B // tb,)

    vmem_limit = int(min(max(_est_bytes(tb) * 3 // 2 + (4 << 20), 32 << 20),
                         100 << 20))

    x_spec = pl.BlockSpec((tb, Sp, Ep), lambda i: (i, 0, 0))
    o_spec = pl.BlockSpec((tb, Sp, Ep), lambda i: (i, 0, 0))
    big_weight = Ep * Wn * cd_bytes > (1 << 20)
    w_spec = _resident_spec((Ep, Wn), big_weight)
    b_spec = _resident_spec((1, Wn), False)

    out = pl.pallas_call(
        _make_kernel(tb, Sp, Ep, S, compute_dtype, Sp != S),
        out_shape=jax.ShapeDtypeStruct((B, Sp, Ep), out_dtype),
        grid_spec=pltpu.PrefetchScalarGridSpec(
            num_scalar_prefetch=0,
            grid=grid,
            in_specs=[x_spec, w_spec, b_spec],
            out_specs=o_spec,
        ),
        compiler_params=pltpu.CompilerParams(
            dimension_semantics=("parallel",),
            vmem_limit_bytes=vmem_limit),
    )(xp, w, bias)

    if padded:
        out = out[:, :S, :E]
    return out


def self_attention_ref(x, wq, bq, wk, bk, wv, bv):
    """Pure-JAX reference mirroring the torch forward (f32, high precision)."""
    hp = jax.lax.Precision.HIGHEST
    q = jnp.einsum("bsj,ej->bse", x, wq, precision=hp) + bq
    k = jnp.einsum("bsj,ej->bse", x, wk, precision=hp) + bk
    v = jnp.einsum("bsj,ej->bse", x, wv, precision=hp) + bv
    scores = jnp.einsum("bse,bsf->bef", k, q, precision=hp)  # k^T @ q per batch
    scores_1 = scores.sum(axis=-1)
    scores_2 = scores_1 / jnp.sqrt(jnp.float32(x.shape[-1]))
    return v * scores_2[:, None, :]


def self_attention_matched_ref(x, wq, bq, wk, bk, wv, bv, compute_dtype):
    """Reference using the same operand dtypes / collapsed algebra as the kernel."""
    E = x.shape[-1]
    scale = float(E) ** -0.5
    f32 = jnp.float32
    xc = x.astype(compute_dtype)
    k = jnp.einsum("bsj,je->bse", xc, wk.T.astype(compute_dtype),
                   preferred_element_type=f32) + bk.astype(f32)
    v = jnp.einsum("bsj,je->bse", xc, wv.T.astype(compute_dtype),
                   preferred_element_type=f32) + bv.astype(f32)
    wqc = (jnp.sum(wq, axis=0) * scale).astype(compute_dtype)
    qs = jnp.einsum("bsj,j->bs", xc, wqc,
                    preferred_element_type=f32) + (jnp.sum(bq) * scale)
    s2 = jnp.sum(k * qs[..., None], axis=1)                          # (B, E)
    return (v * s2[:, None, :]).astype(x.dtype)


if __name__ == "__main__":
    def run_case(B, S, E, case_idx):
        key = jax.random.fold_in(jax.random.PRNGKey(0), case_idx)
        kx, s1, s2k, s3, s4, s5, s6 = jax.random.split(key, 7)
        x = jax.random.normal(kx, (B, S, E), dtype=jnp.float32)

        # nn.Linear-shaped params: W (E, E), b (E,).
        bound = 1.0 / float(E) ** 0.5
        wq = jax.random.uniform(s1, (E, E), jnp.float32, -bound, bound)
        bq = jax.random.uniform(s2k, (E,), jnp.float32, -bound, bound)
        wk = jax.random.uniform(s3, (E, E), jnp.float32, -bound, bound)
        bk = jax.random.uniform(s4, (E,), jnp.float32, -bound, bound)
        wv = jax.random.uniform(s5, (E, E), jnp.float32, -bound, bound)
        bv = jax.random.uniform(s6, (E,), jnp.float32, -bound, bound)

        ref = self_attention_ref(x, wq, bq, wk, bk, wv, bv)
        ref_scale = jnp.max(jnp.abs(ref))

        # 1) exact-precision path (f32 operands end-to-end).
        f32_fn = jax.jit(functools.partial(self_attention,
                                           compute_dtype=jnp.float32))
        out_f32 = jax.block_until_ready(f32_fn(x, wq, bq, wk, bk, wv, bv))
        assert out_f32.shape == (B, S, E)
        err_f32 = jnp.max(jnp.abs(out_f32 - ref)) / ref_scale
        assert err_f32 < 3e-2, f"f32 kernel mismatch vs reference: {err_f32}"

        # 2) default perf path (bf16 MXU operands, f32 accumulation/epilogue):
        #    tight check vs a matched-precision reference + drift check vs f32.
        bf16_fn = jax.jit(functools.partial(self_attention,
                                            compute_dtype=jnp.bfloat16))
        out_bf16 = jax.block_until_ready(bf16_fn(x, wq, bq, wk, bk, wv, bv))
        assert out_bf16.shape == (B, S, E)
        matched = self_attention_matched_ref(x, wq, bq, wk, bk, wv, bv,
                                             jnp.bfloat16)
        assert jnp.allclose(out_bf16, matched, atol=2e-3, rtol=2e-3), \
            "bf16 kernel mismatch vs matched-precision reference"
        err_bf16 = jnp.max(jnp.abs(out_bf16 - ref)) / ref_scale
        assert err_bf16 < 5e-2, f"bf16 kernel drift vs f32 reference: {err_bf16}"

    # Aligned sequence (no mask path), lane-padded E.
    run_case(B=2, S=8, E=32, case_idx=0)
    # Non-multiple-of-8 sequence (exercises the in-kernel iota mask path).
    run_case(B=3, S=12, E=32, case_idx=1)

    print("KERNEL_OK")
</pallas_src>

<mosaic_0001>
module attributes {stable_mosaic.version = 11 : i64} {
  func.func @kernel(%arg0: i32, %arg1: memref<1x8x128xf32, #tpu.memory_space<vmem>>, %arg2: memref<128x384xf32, #tpu.memory_space<vmem>>, %arg3: memref<1x384xf32, #tpu.memory_space<vmem>>, %arg4: memref<1x8x128xf32, #tpu.memory_space<vmem>>) attributes {dimension_semantics = [#tpu.dimension_semantics<parallel>], iteration_bounds = array<i64: 2>, scalar_prefetch = 0 : i64, scratch_operands = 0 : i64, tpu.core_type = #tpu.core_type<tc>, window_params = [{transform_indices = @transform_0, window_bounds = array<i64: 1, 8, 128>}, {pipeline_mode = #tpu.pipeline_mode<synchronous>, transform_indices = @transform_1, window_bounds = array<i64: 128, 384>}, {pipeline_mode = #tpu.pipeline_mode<synchronous>, transform_indices = @transform_2, window_bounds = array<i64: 1, 384>}, {transform_indices = @transform_3, window_bounds = array<i64: 1, 8, 128>}]} {
    %c0 = arith.constant 0 : index
    %c0_0 = arith.constant 0 : index
    %c0_1 = arith.constant 0 : index
    %0 = vector.load %arg1[%c0, %c0_0, %c0_1] : memref<1x8x128xf32, #tpu.memory_space<vmem>>, vector<1x8x128xf32>
    %1 = vector.shape_cast %0 : vector<1x8x128xf32> to vector<8x128xf32>
    %c0_2 = arith.constant 0 : index
    %c0_3 = arith.constant 0 : index
    %2 = vector.load %arg2[%c0_2, %c0_3] : memref<128x384xf32, #tpu.memory_space<vmem>>, vector<128x384xf32>
    %cst = arith.constant dense<0.000000e+00> : vector<8x384xf32>
    %3 = tpu.matmul %1, %2, %cst {dimension_numbers = #tpu.dot_dimension_numbers<[1], [0], [0], [1], [0, 0, 1, 1], [], []>} : vector<8x128xf32>, vector<128x384xf32>, vector<8x384xf32> -> vector<8x384xf32>
    %c0_4 = arith.constant 0 : index
    %c0_5 = arith.constant 0 : index
    %4 = vector.load %arg3[%c0_4, %c0_5] : memref<1x384xf32, #tpu.memory_space<vmem>>, vector<1x384xf32>
    %5 = vector.broadcast %4 : vector<1x384xf32> to vector<8x384xf32>
    %6 = arith.addf %3, %5 : vector<8x384xf32>
    %7 = vector.extract_strided_slice %6 {offsets = [0, 0], sizes = [8, 128], strides = [1, 1]} : vector<8x384xf32> to vector<8x128xf32>
    %8 = vector.extract_strided_slice %6 {offsets = [0, 256], sizes = [8, 1], strides = [1, 1]} : vector<8x384xf32> to vector<8x1xf32>
    %9 = vector.broadcast %8 : vector<8x1xf32> to vector<8x128xf32>
    %10 = arith.mulf %7, %9 : vector<8x128xf32>
    %11 = vector.shape_cast %10 : vector<8x128xf32> to vector<1x8x128xf32>
    %cst_6 = arith.constant dense<0.000000e+00> : vector<1x128xf32>
    %12 = vector.multi_reduction <add>, %11, %cst_6 [1] : vector<1x8x128xf32> to vector<1x128xf32>
    %13 = vector.shape_cast %12 : vector<1x128xf32> to vector<1x1x128xf32>
    %14 = vector.extract_strided_slice %6 {offsets = [0, 128], sizes = [8, 128], strides = [1, 1]} : vector<8x384xf32> to vector<8x128xf32>
    %15 = vector.shape_cast %14 : vector<8x128xf32> to vector<1x8x128xf32>
    %16 = vector.broadcast %13 : vector<1x1x128xf32> to vector<1x8x128xf32>
    %17 = arith.mulf %15, %16 : vector<1x8x128xf32>
    %c0_7 = arith.constant 0 : index
    %c0_8 = arith.constant 0 : index
    %c0_9 = arith.constant 0 : index
    %18 = vector.load %arg4[%c0_7, %c0_8, %c0_9] : memref<1x8x128xf32, #tpu.memory_space<vmem>>, vector<1x8x128xf32>
    tpu.vector_store %arg4[%c0_7, %c0_8, %c0_9], %17 {strides = array<i32>} : memref<1x8x128xf32, #tpu.memory_space<vmem>>, vector<1x8x128xf32>,
    return
  }
  func.func @transform_0(%arg0: i32) -> (i32, i32, i32) {
    %c0_i32 = arith.constant 0 : i32
    %c0_i32_0 = arith.constant 0 : i32
    %c0_i32_1 = arith.constant 0 : i32
    return %arg0, %c0_i32, %c0_i32_0 : i32, i32, i32
  }
  func.func @transform_1(%arg0: i32) -> (i32, i32) {
    %c0_i32 = arith.constant 0 : i32
    %c0_i32_0 = arith.constant 0 : i32
    %c0_i32_1 = arith.constant 0 : i32
    return %c0_i32, %c0_i32_0 : i32, i32
  }
  func.func @transform_2(%arg0: i32) -> (i32, i32) {
    %c0_i32 = arith.constant 0 : i32
    %c0_i32_0 = arith.constant 0 : i32
    %c0_i32_1 = arith.constant 0 : i32
    return %c0_i32, %c0_i32_0 : i32, i32
  }
  func.func @transform_3(%arg0: i32) -> (i32, i32, i32) {
    %c0_i32 = arith.constant 0 : i32
    %c0_i32_0 = arith.constant 0 : i32
    %c0_i32_1 = arith.constant 0 : i32
    return %arg0, %c0_i32, %c0_i32_0 : i32, i32, i32
  }
}

</mosaic_0001>

<bundles_post_ra>
// kernel: self_attention.1
= control target key start
LH: loop header
LB: loop body
LE: loop exit
PB: predicated region body
PF: predicated region fallthrough
CT: control target
= control target key end

     0   :  { %8 = vsyncpa [#allocation3], 0  ;;  %s740_s0 = inlined_call_operand.vmem [shape: f32[2,8,128], index: 0, kind: input, shape index: {}]   ;;  %s741_s1 = inlined_call_operand.vmem [shape: f32[128,384], index: 1, kind: input, shape index: {}]   ;;  %s742_s2 = inlined_call_operand.vmem [shape: f32[1,384], index: 2, kind: input, shape index: {}]   ;;  %s743_s3 = inlined_call_operand.hbm [shape: f32[2,8,128], index: 3, kind: output, shape index: {}]  }
   0x1   :  { %10 = vsyncpa [#allocation3 + $0x1], 0  ;;  %s508_s12 = smov 0   ;;  %s510_s13 = smov 0  }
   0x2   :  { %s512_s14 = smov 0   ;;  %s514_s15 = smov 0  }
   0x3 LB: > { %s529_s16 = sadd.s32 4294967295, %s485_s15   ;;  %s372_s17 = sadd.s32 4294967294, %s485_s15   ;;  %s485_s15 = sphi %s514_s15, %s749_s15   ;;  %s481_s14 = sphi %s512_s14, %s748_s14   ;;  %s477_s13 = sphi %s510_s13, %s747_s13   ;;  %s473_s12 = sphi %s508_s12, %s746_s12  }
   0x4   : > { %s533_s18 = sadd.s32 1, %s485_s15   ;;  %s91_s19 = sadd.s32 1, %s481_s14 }
   0x5   : > { %s88_s20 = ssub.s32 %s485_s15, %s533_s18  ;;  %p101_p0 = scmp.ne.s32.totalorder %s481_s14, %s477_s13 }
   0x6   : > { %p89_p1 = scmp.eq.s32.totalorder %s88_s20, 0  ;;  %p102_p2 = scmp.eq.s32.totalorder %s529_s16, 1 }
   0x7   : > { %p107_p3 = scmp.ne.s32.totalorder %s477_s13, %s473_s12  ;;  %p108_p4 = scmp.eq.s32.totalorder %s372_s17, 1 }
   0x8   : > { %s544_s21 = scalar_select %p89_p1, %s481_s14, %s91_s19  }
   0x9   : > { %p546_p5 = por %p102_p2, %p101_p0  ;;  %p550_p6 = por %p108_p4, %p107_p3 }
   0xa   : > { %p375_p7 = scmp.ge.s32.totalorder %s485_s15, 1  ;;  %p139_p8 = scmp.lt.s32.totalorder %s485_s15, 3 }
   0xc   : > { %p140_p9 = pnand %p375_p7, %p139_p8 }
   0xd   : > { %p162_p10 = scmp.lt.s32.totalorder (!%p140_p9), %s529_s16, 1  ;;  %s159_s11 = sand.u32 (!%p140_p9), 1, %s477_s13  }
   0xe   : > { %143 = sbr.rel (%p140_p9) target bundleno = 319 (0x13f), region = 32  ;;  %s376_s17 = sshll.u32 (!%p140_p9), %s159_s11, 3 }
   0xf   : > { %s161_s26 = scalar_lea.vmem (!%p140_p9), [#allocation2], %s376_s17  ;;  %s443_s5 = scalar_lea.hbm (!%p140_p9), %s743_s3, 16 }
  0x13   : > { %v214_v0 = vld [vmem:[%s741_s1 + $0x178] sm:$0xff]  ;;  %v211_v1 = vld [vmem:[%s741_s1 + $0x160] sm:$0xff]  ;;  %v208_v2 = vld [vmem:[%s741_s1 + $0x148] sm:$0xff]  ;;  %s163_s19 = scalar_select %p162_p10, %s529_s16, 1  ;;  %v487_v49 = vmov 0  }
  0x14   : > { %263 = vmatpush.msra.mxu2 %v214_v0  ;;  %v205_v3 = vld [vmem:[%s741_s1 + $0x130] sm:$0xff]  ;;  %v212_v4 = vld [vmem:[%s741_s1 + $0x168] sm:$0xff]  ;;  %v202_v6 = vld [vmem:[%s741_s1 + $0x118] sm:$0xff]  ;;  %422 = vset.pattern.permute.xlu0 %v487_v49 }
  0x15   : > { %v209_v5 = vld [vmem:[%s741_s1 + $0x150] sm:$0xff]  ;;  %223 = vmatpush.msra.mxu0 %v212_v4  ;;  %v206_v7 = vld [vmem:[%s741_s1 + $0x138] sm:$0xff]  ;;  %v199_v8 = vld [vmem:[%s741_s1 + $0x100] sm:$0xff]  ;;  %s377_s8 = sshll.u32 %s163_s19, 3  ;;  %s310_s19 = sshll.u32 %s161_s26, 4  ;;  %s311_s19 = int_to_ptr.vmem [resolvable:$true] %s310_s19 }
  0x16   : > { %264 = vmatpush.msra.mxu2 %v211_v1  ;;  %v213_v9 = vld [vmem:[%s741_s1 + $0x170] sm:$0xff]  ;;  %v203_v10 = vld [vmem:[%s741_s1 + $0x120] sm:$0xff]  ;;  %v210_v11 = vld [vmem:[%s741_s1 + $0x158] sm:$0xff]  ;;  %s165_s30 = scalar_lea.vmem %s740_s0, %s377_s8  ;;  %s379_s8 = sshll.u32 %s529_s16, 3 }
  0x17   : > { %224 = vmatpush.msra.mxu0 %v209_v5  ;;  %243 = vmatpush.msra.mxu1 %v213_v9  ;;  %v196_v12 = vld [vmem:[%s741_s1 + $0xe8] sm:$0xff]  ;;  %v207_v13 = vld [vmem:[%s741_s1 + $0x140] sm:$0xff]  ;;  %v193_v15 = vld [vmem:[%s741_s1 + $0xd0] sm:$0xff]  ;;  %s308_s25 = scalar_lea.hbm %s743_s3, %s379_s8  ;;  %s298_s16 = scalar_lea.sflag [#allocation3], %s159_s11 }
  0x18   : > { %265 = vmatpush.msra.mxu2 %v208_v2  ;;  %v200_v14 = vld [vmem:[%s741_s1 + $0x108] sm:$0xff]  ;;  %v197_v17 = vld [vmem:[%s741_s1 + $0xf0] sm:$0xff]  ;;  %v190_v18 = vld [vmem:[%s741_s1 + $0xb8] sm:$0xff]  ;;  %s312_s27 = sshll.u32 %s308_s25, 4  ;;  %s313_s27 = int_to_ptr.hbm [resolvable:$true] %s312_s27 }
  0x19   : > { %225 = vmatpush.msra.mxu0 %v206_v7  ;;  %244 = vmatpush.msra.mxu1 %v210_v11  ;;  %v204_v16 = vld [vmem:[%s741_s1 + $0x128] sm:$0xff]  ;;  %v201_v19 = vld [vmem:[%s741_s1 + $0x110] sm:$0xff]  ;;  %v194_v20 = vld [vmem:[%s741_s1 + $0xd8] sm:$0xff]  ;;  %s437_s28 = sshra.s32 %s313_s27, 4  ;;  %s438_s28 = int_to_ptr.hbm [resolvable:$true] %s437_s28 }
  0x1a   : > { %266 = vmatpush.msra.mxu2 %v205_v3  ;;  %v187_v21 = vld [vmem:[%s741_s1 + $0xa0] sm:$0xff]  ;;  %v198_v22 = vld [vmem:[%s741_s1 + $0xf8] sm:$0xff]  ;;  %v184_v24 = vld [vmem:[%s741_s1 + $0x88] sm:$0xff]  ;;  %s439_s29 = scalar_lea.hbm %s438_s28, 8  ;;  %p444_p0 = scmp.lt.s32.totalorder %s438_s28, %s743_s3 }
  0x1b   : > { %226 = vmatpush.msra.mxu0 %v203_v10  ;;  %245 = vmatpush.msra.mxu1 %v207_v13  ;;  %v191_v23 = vld [vmem:[%s741_s1 + $0xc0] sm:$0xff]  ;;  %v188_v26 = vld [vmem:[%s741_s1 + $0xa8] sm:$0xff]  ;;  %v181_v27 = vld [vmem:[%s741_s1 + $0x70] sm:$0xff]  ;;  %p440_p11 = scmp.ne.s32.totalorder %s438_s28, %s439_s29  ;;  %p445_p1 = scmp.lt.s32.totalorder %s443_s5, %s439_s29 }
  0x1c   : > { %267 = vmatpush.msra.mxu2 %v202_v6  ;;  %v195_v25 = vld [vmem:[%s741_s1 + $0xe0] sm:$0xff]  ;;  %v192_v28 = vld [vmem:[%s741_s1 + $0xc8] sm:$0xff]  ;;  %v185_v29 = vld [vmem:[%s741_s1 + $0x90] sm:$0xff] }
  0x1d   : > { %227 = vmatpush.msra.mxu0 %v200_v14  ;;  %246 = vmatpush.msra.mxu1 %v204_v16  ;;  %v178_v30 = vld [vmem:[%s741_s1 + $0x58] sm:$0xff]  ;;  %v189_v31 = vld [vmem:[%s741_s1 + $0xb0] sm:$0xff]  ;;  %v175_v33 = vld [vmem:[%s741_s1 + $0x40] sm:$0xff]  ;;  %p441_p12 = pnand %p440_p11, %p546_p5  ;;  %p446_p2 = por %p445_p1, %p444_p0 }
  0x1e   : > { %268 = vmatpush.msra.mxu2 %v199_v8  ;;  %v182_v32 = vld [vmem:[%s741_s1 + $0x78] sm:$0xff]  ;;  %v179_v35 = vld [vmem:[%s741_s1 + $0x60] sm:$0xff]  ;;  %v172_v36 = vld [vmem:[%s741_s1 + $0x28] sm:$0xff] }
  0x1f   : > { %228 = vmatpush.msra.mxu0 %v197_v17  ;;  %247 = vmatpush.msra.mxu1 %v201_v19  ;;  %v186_v34 = vld [vmem:[%s741_s1 + $0x98] sm:$0xff]  ;;  %v183_v37 = vld [vmem:[%s741_s1 + $0x80] sm:$0xff]  ;;  %v176_v38 = vld [vmem:[%s741_s1 + $0x48] sm:$0xff]  ;;  %p442_p13 = pneg %p441_p12 }
  0x20   : > { %269 = vmatpush.msra.mxu2 %v196_v12  ;;  %v169_v39 = vld [vmem:[%s741_s1 + $0x10] sm:$0xff]  ;;  %v180_v40 = vld [vmem:[%s741_s1 + $0x68] sm:$0xff]  ;;  %v166_v41 = vld [vmem:[%s165_s30] sm:$0xff] }
  0x21   : > { %229 = vmatpush.msra.mxu0 %v194_v20  ;;  %248 = vmatpush.msra.mxu1 %v198_v22  ;;  %v173_v42 = vld [vmem:[%s741_s1 + $0x30] sm:$0xff]  ;;  %v170_v44 = vld [vmem:[%s741_s1 + $0x18] sm:$0xff]  ;;  %v167_v46 = vld [vmem:[%s741_s1] sm:$0xff]  ;;  %p447_p3 = pnand %p446_p2, %p442_p13 }
  0x22   : > { %270 = vmatpush.msra.mxu2 %v193_v15  ;;  %v177_v43 = vld [vmem:[%s741_s1 + $0x50] sm:$0xff]  ;;  %v174_v45 = vld [vmem:[%s741_s1 + $0x38] sm:$0xff]  ;;  %v171_v47 = vld [vmem:[%s741_s1 + $0x20] sm:$0xff] }
  0x23   : > { %230 = vmatpush.msra.mxu0 %v191_v23  ;;  %249 = vmatpush.msra.mxu1 %v195_v25  ;;  %v168_v48 = vld [vmem:[%s741_s1 + $0x8] sm:$0xff]  ;;  %v215_v50 = vld [vmem:[%s742_s2] sm:$0x7] }
  0x24   : > { %271 = vmatpush.msra.mxu2 %v190_v18  ;;  %v219_v51 = vperm.slane %v215_v50, 2  ;;  %v217_v54 = vperm.slane %v215_v50, 0  ;;  %v218_v62 = vperm.slane %v215_v50, 1 }
  0x25   : > { %231 = vmatpush.msra.mxu0 %v188_v26  ;;  %250 = vmatpush.msra.mxu1 %v192_v28 }
  0x26   : > { %272 = vmatpush.msra.mxu2 %v187_v21 }
  0x27   : > { %232 = vmatpush.msra.mxu0 %v185_v29  ;;  %251 = vmatpush.msra.mxu1 %v189_v31 }
  0x28   : > { %273 = vmatpush.msra.mxu2 %v184_v24 }
  0x29   : > { %233 = vmatpush.msra.mxu0 %v182_v32  ;;  %252 = vmatpush.msra.mxu1 %v186_v34 }
  0x2a   : > { %274 = vmatpush.msra.mxu2 %v181_v27 }
  0x2b   : > { %234 = vmatpush.msra.mxu0 %v179_v35  ;;  %253 = vmatpush.msra.mxu1 %v183_v37 }
  0x2c   : > { %275 = vmatpush.msra.mxu2 %v178_v30 }
  0x2d   : > { %235 = vmatpush.msra.mxu0 %v176_v38  ;;  %254 = vmatpush.msra.mxu1 %v180_v40 }
  0x2e   : > { %276 = vmatpush.msra.mxu2 %v175_v33 }
  0x2f   : > { %236 = vmatpush.msra.mxu0 %v173_v42  ;;  %255 = vmatpush.msra.mxu1 %v177_v43 }
  0x30   : > { %277 = vmatpush.msra.mxu2 %v172_v36 }
  0x31   : > { %237 = vmatpush.msra.mxu0 %v170_v44  ;;  %256 = vmatpush.msra.mxu1 %v174_v45 }
  0x32   : > { %278 = vmatpush.msra.mxu2 %v169_v39 }
  0x33   : > { %279 = vmatmul.f32.vlgmr.msra.gmra.mxu2 %v166_v41  ;;  %238 = vmatpush.msra.mxu0 %v167_v46 }
  0x34   : > { %239 = vmatmul.f32.vlgmr.msra.gmra.mxu0 %v166_v41  ;;  %257 = vmatpush.msra.mxu1 %v171_v47 }
  0x36   : > { %258 = vmatpush.msra.mxu1 %v168_v48 }
  0x37   : > { %259 = vmatmul.f32.vlgmr.msra.gmra.mxu1 %v166_v41 }
  0xb1   : > { %v240_v55 = vpop.f32.mrf.mxu0 }
  0xb2   : > { %v241_v56 = vadd.f32 %v240_v55, %v217_v54 }
  0xb4   : > { %v260_v63 = vpop.f32.mrf.mxu1 }
  0xb5   : > { %v261_v1 = vadd.f32 %v260_v63, %v218_v62 }
  0xb6   : > { %v280_v52 = vpop.f32.mrf.mxu2 }
  0xb7   : > { %v281_v53 = vadd.f32 %v280_v52, %v219_v51 }
  0xb9   : > { %285 = vperm.xlu0 %422, %v281_v53  }
 0x12b   : > { %v286_v57 = vpop.permute.xlu0 %285 }
 0x12c   : > { %v288_v58 = vmul.f32 %v286_v57, %v241_v56 }
 0x12e   : > { %v289_v59 = vrot.slane %v288_v58, 4 }
 0x130   : > { %v290_v60 = vadd.f32 %v289_v59, %v288_v58 }
 0x132   : > { %v291_v61 = vrot.slane %v290_v60, 2 }
 0x134   : > { %v292_v0 = vadd.f32 %v291_v61, %v290_v60 }
 0x136   : > { %v293_v2 = vrot.slane %v292_v0, 1 }
 0x138   : > { %v294_v3 = vadd.f32 %v293_v2, %v292_v0 }
 0x13a   : > { %v295_v4 = vmul.f32 %v294_v3, %v261_v1 }
 0x13c   : > { %296 = vst [vmem:[%s161_s26] sm:$0xff] %v295_v4 }
 0x13d   : > { %450 = shalt.err (!%p447_p3)
}
 0x13e   : > { %382 = dma.vmem_to_hbm [thread:$0]  (%p546_p5), %s311_s19, 128, %s313_s27, %s298_s16  }
 0x13f PF: > { %p388_p4 = scmp.ge.s32.totalorder %s485_s15, 2  ;;  %s324_s9 = sand.u32 1, %s473_s12  }
 0x140   : > { %s325_s10 = scalar_lea.sflag [#allocation3], %s324_s9 }
 0x141   : > { %p385_p7 = pnand %p388_p4, %p550_p6 }
 0x143   : > { %p386_p8 = pneg %p385_p7 }
 0x145   : > { %468 = dma.done.wait (%p386_p8), %s325_s10, 128  }
 0x146   : > { %470 = vsyncadd (%p386_p8), %s325_s10, 4294967168  ;;  %p13_p9 = scmp.ge.s32.totalorder %s533_s18, 4   ;;  %s746_s12 = smov %s477_s13 }
 0x147   : > { %s747_s13 = smov %s481_s14  ;;  %s748_s14 = smov %s544_s21 }
 0x148   : > { %s749_s15 = smov %s533_s18  ;;  %15 = sbr.rel (!%p13_p9) target bundleno = 3 (0x3), region = 67 }
 0x14d   :  { %331 = vsyncpa [#allocation3], 1 }
 0x14e   :  { %333 = vsyncpa [#allocation3 + $0x1], 1 }

</bundles_post_ra>
